<compile_context>
chip_gen: v7x
topology: tpu7x:2x2x1
jax: 0.10.0
libtpu: 0.0.40
codegen_flags: <defaults>
</compile_context>

<pallas_src>
import jax
import jax.numpy as jnp
from jax.experimental import pallas as pl
from jax.experimental.pallas import tpu as pltpu

IN_FEATURES = 7
HIDDEN = 8
OUT_FEATURES = 1
NEG_SLOPE = 0.2

# Batch tile (lanes). 65536 lanes of f32:
#   x block   (7->8 sublanes, 65536) ~ 2 MiB  (x2 pipeline buffers)
#   out block (1->8 sublanes, 65536) ~ 2 MiB  (x2 pipeline buffers)
#   h temp    (8, 65536)             ~ 2 MiB
# => ~12-16 MiB total: inside the 32 MiB scoped / 64 MiB physical VMEM of v7x,
# and amortizes the ~0.35 us fixed per-grid-step overhead to <10%.
DEFAULT_TILE_N = 65536
_VMEM_LIMIT_BYTES = 48 * 1024 * 1024  # safe on v5e/v6e (128 MiB) and v7x (64 MiB)


def _round_up(x, m):
    return ((x + m - 1) // m) * m


def _classifier_kernel(x_ref, w1t_ref, b1_ref, w2t_ref, b2_ref, o_ref):
    # x_ref  : (7, T)   features on sublanes, batch on lanes
    # w1t_ref: (8, 7)   row h = hidden unit, col = input feature
    # b1_ref : (8, 1)
    # w2t_ref: (1, 8)
    # b2_ref : (1, 1)
    # o_ref  : (1, T)
    x = x_ref[...]

    # Layer 1 on the MXU: (8,7) @ (7,T) -> (8,T). HIGHEST keeps full f32 accuracy.
    h = jnp.dot(
        w1t_ref[...], x,
        preferred_element_type=jnp.float32,
        precision=jax.lax.Precision.HIGHEST,
    )
    h = h + b1_ref[...]

    # LeakyReLU(0.2) on the VPU.
    h = jnp.where(h >= 0.0, h, NEG_SLOPE * h)

    # Layer 2 on the MXU: (1,8) @ (8,T) -> (1,T).
    z = jnp.dot(
        w2t_ref[...], h,
        preferred_element_type=jnp.float32,
        precision=jax.lax.Precision.HIGHEST,
    )
    z = z + b2_ref[...]

    # Numerically stable sigmoid: exp and reciprocal on the EUP slot.
    e = jnp.exp(-jnp.abs(z))
    inv = pl.reciprocal(1.0 + e, approx=True)
    o_ref[...] = jnp.where(z >= 0.0, inv, e * inv).astype(o_ref.dtype)


def classifier_forward(x, w1, b1, w2, b2, *, tile_n=DEFAULT_TILE_N,
                       x_is_feature_major=False):
    """COMPAS classifier forward pass.

    x : (N, 7) f32  (or (7, N) if x_is_feature_major=True -> skips the relayout)
    w1: (7, 8), b1: (8,), w2: (8, 1), b2: (1,);  y = sigmoid(leaky(x@w1+b1)@w2+b2)
    Returns (N, 1) probabilities.
    """
    x = x.astype(jnp.float32)
    n = x.shape[1] if x_is_feature_major else x.shape[0]

    # ---- tile / padding selection ----------------------------------------
    # Pad the batch only to a multiple of 128 lanes (not of the tile), then pick
    # a tile that splits the padded batch into equal 128-aligned chunks. Force
    # >=2 tiles when the batch allows it so the "parallel" axis feeds both
    # TensorCores on v7x (harmless ~0.35us extra on single-TC v5e/v6e).
    n_pad128 = _round_up(max(n, 1), 128)
    num_tiles = pl.cdiv(n_pad128, max(_round_up(tile_n, 128), 128))
    if num_tiles == 1 and n_pad128 >= 256:
        num_tiles = 2
    tile = _round_up(pl.cdiv(n_pad128, num_tiles), 128)
    n_padded = num_tiles * tile

    # ---- single relayout pass: pad fused with the one transpose copy -------
    # TODO(synk): store the dataset feature-major (7, N) upstream so this
    # relayout disappears entirely (the kernel itself only moves ~32 B/element).
    if x_is_feature_major:
        x_t = x if n_padded == n else jnp.pad(x, ((0, 0), (0, n_padded - n)))
    else:
        x_p = x if n_padded == n else jnp.pad(x, ((0, n_padded - n), (0, 0)))
        x_t = x_p.T  # (7, n_padded); XLA fuses the pad into this single copy

    w1t = w1.astype(jnp.float32).T                                  # (8, 7)
    b1c = b1.astype(jnp.float32).reshape(HIDDEN, 1)                 # (8, 1)
    w2t = w2.astype(jnp.float32).reshape(HIDDEN, OUT_FEATURES).T    # (1, 8)
    b2c = b2.astype(jnp.float32).reshape(1, 1)                      # (1, 1)

    out = pl.pallas_call(
        _classifier_kernel,
        out_shape=jax.ShapeDtypeStruct((1, n_padded), jnp.float32),
        grid=(num_tiles,),
        in_specs=[
            # Batch-tiled input: double-buffered by the Pallas pipeline.
            pl.BlockSpec((IN_FEATURES, tile), lambda i: (0, i)),
            # Tiny weights/biases: constant index_map -> fetched once, resident.
            pl.BlockSpec((HIDDEN, IN_FEATURES), lambda i: (0, 0)),
            pl.BlockSpec((HIDDEN, 1), lambda i: (0, 0)),
            pl.BlockSpec((1, HIDDEN), lambda i: (0, 0)),
            pl.BlockSpec((1, 1), lambda i: (0, 0)),
        ],
        out_specs=pl.BlockSpec((1, tile), lambda i: (0, i)),
        compiler_params=pltpu.CompilerParams(
            dimension_semantics=("parallel",),   # shard batch tiles across TCs (v7x)
            vmem_limit_bytes=_VMEM_LIMIT_BYTES,
        ),
    )(x_t, w1t, b1c, w2t, b2c)

    # Module semantics: return (N, 1) like the PyTorch model. Consumers that can
    # take (1, N) / (N,) should slice `out` directly to avoid a possible relayout.
    return out[:, :n].reshape(n, OUT_FEATURES)


def init_params(key):
    """Deterministic init mimicking torch.nn.Linear default (uniform +-1/sqrt(fan_in))."""
    k1, k2, k3, k4 = jax.random.split(key, 4)
    bound1 = 1.0 / jnp.sqrt(IN_FEATURES)
    bound2 = 1.0 / jnp.sqrt(HIDDEN)
    w1 = jax.random.uniform(k1, (IN_FEATURES, HIDDEN), jnp.float32, -bound1, bound1)
    b1 = jax.random.uniform(k2, (HIDDEN,), jnp.float32, -bound1, bound1)
    w2 = jax.random.uniform(k3, (HIDDEN, OUT_FEATURES), jnp.float32, -bound2, bound2)
    b2 = jax.random.uniform(k4, (OUT_FEATURES,), jnp.float32, -bound2, bound2)
    return w1, b1, w2, b2


def reference_forward(x, w1, b1, w2, b2):
    h = x @ w1 + b1
    h = jnp.where(h >= 0.0, h, NEG_SLOPE * h)
    z = h @ w2 + b2
    return jax.nn.sigmoid(z)


if __name__ == "__main__":
    key = jax.random.PRNGKey(0)
    kp, kx1, kx2 = jax.random.split(key, 3)

    w1, b1, w2, b2 = init_params(kp)

    # Tolerance note: approx reciprocal (EUP) in the sigmoid epilogue trades a
    # few 1e-4 of absolute accuracy for VALU cycles, hence 2e-3 tolerances.
    TOL = dict(atol=2e-3, rtol=2e-3)

    # Small test: single tile.
    batch = 16
    x = jax.random.normal(kx1, (batch, IN_FEATURES), jnp.float32)
    y = jax.block_until_ready(classifier_forward(x, w1, b1, w2, b2))
    y_ref = reference_forward(x, w1, b1, w2, b2)
    assert y.shape == (batch, OUT_FEATURES)
    assert jnp.allclose(y, y_ref, **TOL), "mismatch vs reference (small)"

    # Multi-tile test with padding + remainder handling (grid of 3 tiles).
    batch2 = 300
    x2 = jax.random.normal(kx2, (batch2, IN_FEATURES), jnp.float32)
    y2 = jax.block_until_ready(classifier_forward(x2, w1, b1, w2, b2, tile_n=128))
    y2_ref = reference_forward(x2, w1, b1, w2, b2)
    assert y2.shape == (batch2, OUT_FEATURES)
    assert jnp.allclose(y2, y2_ref, **TOL), "mismatch vs reference (tiled)"

    # Feature-major fast path: no wrapper transpose at all.
    y3 = jax.block_until_ready(
        classifier_forward(x2.T, w1, b1, w2, b2, tile_n=128, x_is_feature_major=True))
    assert y3.shape == (batch2, OUT_FEATURES)
    assert jnp.allclose(y3, y2_ref, **TOL), "mismatch vs reference (feature-major)"

    print("KERNEL_OK")
</pallas_src>

<mosaic_0001>
module attributes {stable_mosaic.version = 11 : i64} {
  func.func @_classifier_kernel(%arg0: i32, %arg1: memref<7x128xf32, #tpu.memory_space<vmem>>, %arg2: memref<8x7xf32, #tpu.memory_space<vmem>>, %arg3: memref<8x1xf32, #tpu.memory_space<vmem>>, %arg4: memref<1x8xf32, #tpu.memory_space<vmem>>, %arg5: memref<1x1xf32, #tpu.memory_space<vmem>>, %arg6: memref<1x128xf32, #tpu.memory_space<vmem>>) attributes {dimension_semantics = [#tpu.dimension_semantics<parallel>], iteration_bounds = array<i64: 1>, scalar_prefetch = 0 : i64, scratch_operands = 0 : i64, tpu.core_type = #tpu.core_type<tc>, window_params = [{transform_indices = @transform_0, window_bounds = array<i64: 7, 128>}, {pipeline_mode = #tpu.pipeline_mode<synchronous>, transform_indices = @transform_1, window_bounds = array<i64: 8, 7>}, {pipeline_mode = #tpu.pipeline_mode<synchronous>, transform_indices = @transform_2, window_bounds = array<i64: 8, 1>}, {pipeline_mode = #tpu.pipeline_mode<synchronous>, transform_indices = @transform_3, window_bounds = array<i64: 1, 8>}, {pipeline_mode = #tpu.pipeline_mode<synchronous>, transform_indices = @transform_4, window_bounds = array<i64: 1, 1>}, {transform_indices = @transform_5, window_bounds = array<i64: 1, 128>}]} {
    %c0 = arith.constant 0 : index
    %c0_0 = arith.constant 0 : index
    %0 = vector.load %arg1[%c0, %c0_0] : memref<7x128xf32, #tpu.memory_space<vmem>>, vector<7x128xf32>
    %c0_1 = arith.constant 0 : index
    %c0_2 = arith.constant 0 : index
    %1 = vector.load %arg2[%c0_1, %c0_2] : memref<8x7xf32, #tpu.memory_space<vmem>>, vector<8x7xf32>
    %cst = arith.constant dense<0.000000e+00> : vector<8x128xf32>
    %2 = tpu.matmul %1, %0, %cst {dimension_numbers = #tpu.dot_dimension_numbers<[1], [0], [0], [1], [0, 0, 1, 1], [], []>, precision = #tpu.contract_precision<fp32>} : vector<8x7xf32>, vector<7x128xf32>, vector<8x128xf32> -> vector<8x128xf32>
    %c0_3 = arith.constant 0 : index
    %c0_4 = arith.constant 0 : index
    %3 = vector.load %arg3[%c0_3, %c0_4] : memref<8x1xf32, #tpu.memory_space<vmem>>, vector<8x1xf32>
    %4 = vector.broadcast %3 : vector<8x1xf32> to vector<8x128xf32>
    %5 = arith.addf %2, %4 : vector<8x128xf32>
    %cst_5 = arith.constant 0.000000e+00 : f32
    %6 = vector.broadcast %cst_5 : f32 to vector<8x128xf32>
    %7 = arith.cmpf oge, %5, %6 : vector<8x128xf32>
    %cst_6 = arith.constant 2.000000e-01 : f32
    %8 = vector.broadcast %cst_6 : f32 to vector<8x128xf32>
    %9 = arith.mulf %8, %5 : vector<8x128xf32>
    %10 = arith.select %7, %5, %9 : vector<8x128xi1>, vector<8x128xf32>
    %c0_7 = arith.constant 0 : index
    %c0_8 = arith.constant 0 : index
    %11 = vector.load %arg4[%c0_7, %c0_8] : memref<1x8xf32, #tpu.memory_space<vmem>>, vector<1x8xf32>
    %cst_9 = arith.constant dense<0.000000e+00> : vector<1x128xf32>
    %12 = tpu.matmul %11, %10, %cst_9 {dimension_numbers = #tpu.dot_dimension_numbers<[1], [0], [0], [1], [0, 0, 1, 1], [], []>, precision = #tpu.contract_precision<fp32>} : vector<1x8xf32>, vector<8x128xf32>, vector<1x128xf32> -> vector<1x128xf32>
    %c0_10 = arith.constant 0 : index
    %c0_11 = arith.constant 0 : index
    %13 = vector.load %arg5[%c0_10, %c0_11] : memref<1x1xf32, #tpu.memory_space<vmem>>, vector<1x1xf32>
    %14 = vector.broadcast %13 : vector<1x1xf32> to vector<1x128xf32>
    %15 = arith.addf %12, %14 : vector<1x128xf32>
    %16 = math.absf %15 : vector<1x128xf32>
    %cst_12 = arith.constant 0.000000e+00 : f32
    %17 = vector.broadcast %cst_12 : f32 to vector<1x128xf32>
    %18 = arith.subf %17, %16 : vector<1x128xf32>
    %19 = math.exp %18 : vector<1x128xf32>
    %cst_13 = arith.constant 1.000000e+00 : f32
    %20 = vector.broadcast %cst_13 : f32 to vector<1x128xf32>
    %21 = arith.addf %20, %19 : vector<1x128xf32>
    %22 = tpu.reciprocal %21 {approx = true} : vector<1x128xf32> -> vector<1x128xf32>
    %cst_14 = arith.constant 0.000000e+00 : f32
    %23 = vector.broadcast %cst_14 : f32 to vector<1x128xf32>
    %24 = arith.cmpf oge, %15, %23 : vector<1x128xf32>
    %25 = arith.mulf %19, %22 : vector<1x128xf32>
    %26 = arith.select %24, %22, %25 : vector<1x128xi1>, vector<1x128xf32>
    %c0_15 = arith.constant 0 : index
    %c0_16 = arith.constant 0 : index
    %27 = vector.load %arg6[%c0_15, %c0_16] : memref<1x128xf32, #tpu.memory_space<vmem>>, vector<1x128xf32>
    tpu.vector_store %arg6[%c0_15, %c0_16], %26 {strides = array<i32>} : memref<1x128xf32, #tpu.memory_space<vmem>>, vector<1x128xf32>,
    return
  }
  func.func @transform_0(%arg0: i32) -> (i32, i32) {
    %c0_i32 = arith.constant 0 : i32
    %c0_i32_0 = arith.constant 0 : i32
    return %c0_i32, %arg0 : i32, i32
  }
  func.func @transform_1(%arg0: i32) -> (i32, i32) {
    %c0_i32 = arith.constant 0 : i32
    %c0_i32_0 = arith.constant 0 : i32
    %c0_i32_1 = arith.constant 0 : i32
    return %c0_i32, %c0_i32_0 : i32, i32
  }
  func.func @transform_2(%arg0: i32) -> (i32, i32) {
    %c0_i32 = arith.constant 0 : i32
    %c0_i32_0 = arith.constant 0 : i32
    %c0_i32_1 = arith.constant 0 : i32
    return %c0_i32, %c0_i32_0 : i32, i32
  }
  func.func @transform_3(%arg0: i32) -> (i32, i32) {
    %c0_i32 = arith.constant 0 : i32
    %c0_i32_0 = arith.constant 0 : i32
    %c0_i32_1 = arith.constant 0 : i32
    return %c0_i32, %c0_i32_0 : i32, i32
  }
  func.func @transform_4(%arg0: i32) -> (i32, i32) {
    %c0_i32 = arith.constant 0 : i32
    %c0_i32_0 = arith.constant 0 : i32
    %c0_i32_1 = arith.constant 0 : i32
    return %c0_i32, %c0_i32_0 : i32, i32
  }
  func.func @transform_5(%arg0: i32) -> (i32, i32) {
    %c0_i32 = arith.constant 0 : i32
    %c0_i32_0 = arith.constant 0 : i32
    return %c0_i32, %arg0 : i32, i32
  }
}

</mosaic_0001>

<bundles_post_ra>
// kernel: tpu_custom_call.1
= control target key start
LH: loop header
LB: loop body
LE: loop exit
PB: predicated region body
PF: predicated region fallthrough
CT: control target
= control target key end

     0   :  { %s1209_s0 = inlined_call_operand.vmem [shape: f32[7,128], index: 0, kind: input, shape index: {}]   ;;  %s1210_s1 = inlined_call_operand.vmem [shape: f32[8,7], index: 1, kind: input, shape index: {}]   ;;  %s1211_s2 = inlined_call_operand.vmem [shape: f32[8,1], index: 2, kind: input, shape index: {}]   ;;  %s1212_s3 = inlined_call_operand.vmem [shape: f32[1,8], index: 3, kind: input, shape index: {}]   ;;  %s1213_s4 = inlined_call_operand.<no memory space> [shape: f32[1,1], index: 4, kind: input, shape index: {}]   ;;  %s1214_s5 = inlined_call_operand.hbm [shape: f32[1,128], index: 5, kind: output, shape index: {}]  }
   0x1   :  { %v10_v0 = vstv %s1213_s4 }
   0x2   :  { %11 = vst [vmem:[#allocation2] sm:$0x1] %v10_v0 }
   0x3   :  { %v23_v1 = vld [vmem:[%s1209_s0] sm:$0x7f]  ;;  %vm35_vm0 = vcmask 1046528   ;;  %v1112_v3 = vmov 0.0   ;;  %vm1113_vm1 = vmmov 0   ;;  %vm31_vm2 = vcmask 56320  }
   0x4   :  { %v24_v2 = vld [vmem:[%s1210_s1] sm:$0xff]  ;;  %997 = vmatprep.subr.mxu0 %v1112_v3  ;;  %v37_v4 = vsel %vm35_vm0, %v23_v1, 0  ;;  %999 = vmatprep.mubr.msk.f32.mxu0 %vm1113_vm1, %v1112_v3  ;;  %v1114_v8 = vmov 0  }
   0x5   :  { %v25_v5 = vld [vmem:[%s1211_s2] sm:$0xff]  ;;  %v40_v6 = vand.u32 4294901760, %v37_v4  ;;  %v33_v7 = vsel %vm31_vm2, %v24_v2, 0  ;;  %1083 = vset.pattern.permute.xlu0 %v1114_v8  ;;  %1027 = vmatprep.subr.mxu1 %v1112_v3 }
   0x6   :  { %12 = vsyncpa [#allocation4], 0  ;;  %v105_v9 = vand.u32 4294901760, %v33_v7  ;;  %28 = vperm.xlu0 %1083, %v25_v5   ;;  %1029 = vmatprep.mubr.msk.f32.mxu1 %vm1113_vm1, %v1112_v3  ;;  %v488_v19 = vld [vmem:[%s1212_s3] sm:$0x1]  ;;  %vm499_vm3 = vcmask 64512   ;;  %v495_v37 = vlaneseq }
   0x7   :  { %998 = vmatpush3.msra.mxu0 %v40_v6  ;;  %v117_v10 = vsub.f32 %v37_v4, %v40_v6  ;;  %v501_v20 = vsel %vm499_vm3, %v488_v19, 0  ;;  %s1115_s2 = smov [#allocation3]  }
   0x8   :  { %v106_v12 = vsub.f32 %v33_v7, %v105_v9  ;;  %1002 = vmatprep.subr.mxu0 %v1112_v3  ;;  %v569_v21 = vand.u32 4294901760, %v501_v20  ;;  %v496_v38 = vshrl.u32 %v495_v37, 7  ;;  %s965_s3 = sshll.u32 %s1115_s2, 4  ;;  %s966_s3 = int_to_ptr.vmem [resolvable:$true] %s965_s3 }
   0x9   :  { %v489_v11 = vld [vmem:[#allocation2] sm:$0x1]  ;;  %v118_v13 = vand.u32 4294901760, %v117_v10  ;;  %s1088_s25 = scalar_lea.vmem %s966_s3, 16  ;;  %s1092_s26 = scalar_lea.vmem %s966_s3, 32 }
   0xa   :  { %v107_v14 = vand.u32 4294901760, %v106_v12  ;;  %492 = vperm.xlu0 %1083, %v489_v11   ;;  %v570_v22 = vsub.f32 %v501_v20, %v569_v21  ;;  %v497_v39 = vsub.s32 0, %v496_v38  ;;  %p1089_p0 = scmp.ne.s32.totalorder %s966_s3, %s1088_s25  ;;  %p1093_p1 = scmp.lt.s32.totalorder %s966_s3, %s966_s3 }
   0xb   :  { %v119_v15 = vsub.f32 %v117_v10, %v118_v13  ;;  %p1094_p2 = scmp.lt.s32.totalorder %s1092_s26, %s1088_s25 }
   0xc   :  { %v108_v16 = vsub.f32 %v106_v12, %v107_v14  ;;  %v571_v23 = vand.u32 4294901760, %v570_v22 }
   0xd   :  { %v120_v17 = vand.u32 4294901760, %v119_v15  ;;  %p1095_p3 = por %p1094_p2, %p1093_p1 }
   0xe   :  { %v109_v18 = vand.u32 4294901760, %v108_v16  ;;  %v572_v28 = vsub.f32 %v570_v22, %v571_v23 }
   0xf   :  { %p1096_p4 = pnand %p1095_p3, %p1089_p0 }
  0x10   :  { %1000 = vmatmul.mubr.f32.vlgmr.msra.gmra.mrb[0].mxu0 %v109_v18  ;;  %v573_v31 = vand.u32 4294901760, %v572_v28 }
  0x11   :  { %1003 = vmatpush3.msra.mxu0 %v120_v17  ;;  %1004 = vmatprep.mubr.msk.f32.mxu0 %vm1113_vm1, %v1112_v3 }
  0x12   :  { %1007 = vmatprep.subr.mxu0 %v1112_v3 }
  0x18   :  { %1005 = vmatmul.mubr.f32.vlgmr.msra.gmra.mrb[0].mxu0 %v105_v9 }
  0x19   :  { %1008 = vmatpush3.msra.mxu0 %v117_v10  ;;  %1009 = vmatprep.mubr.msk.f32.mxu0 %vm1113_vm1, %v1112_v3 }
  0x1a   :  { %1012 = vmatprep.subr.mxu0 %v1112_v3 }
  0x20   :  { %1010 = vmatmul.mubr.f32.vlgmr.msra.gmra.mrb[0].mxu0 %v106_v12 }
  0x21   :  { %1013 = vmatpush3.msra.mxu0 %v40_v6  ;;  %1014 = vmatprep.mubr.msk.f32.mxu0 %vm1113_vm1, %v1112_v3 }
  0x22   :  { %1017 = vmatprep.subr.mxu0 %v1112_v3 }
  0x28   :  { %1015 = vmatmul.mubr.f32.vlgmr.msra.gmra.mrb[0].mxu0 %v107_v14 }
  0x29   :  { %1018 = vmatpush3.msra.mxu0 %v118_v13  ;;  %1019 = vmatprep.mubr.msk.f32.mxu0 %vm1113_vm1, %v1112_v3 }
  0x2a   :  { %1022 = vmatprep.subr.mxu0 %v1112_v3 }
  0x30   :  { %1020 = vmatmul.mubr.f32.vlgmr.msra.gmra.mrb[0].mxu0 %v105_v9 }
  0x31   :  { %1023 = vmatpush3.msra.mxu0 %v40_v6  ;;  %1024 = vmatprep.mubr.msk.f32.mxu0 %vm1113_vm1, %v1112_v3 }
  0x38   :  { %1025 = vmatmul.mubr.f32.vlgmr.msra.gmra.mrb[0].mxu0 %v105_v9 }
  0x85   :  { %v29_v24 = vpop.permute.xlu0 %28 }
  0x89   :  { %v493_v40 = vpop.permute.xlu0 %492 }
  0x8a   :  { %v498_v41 = vrot.slane %v493_v40, %v497_v39 }
 0x10b   :  { %v481_v25 = vpop.f32.mrb[0].mxu0 }
 0x10c   :  { %v1057_v26 = vadd.f32 %v481_v25, %v29_v24  ;;  %v1026_v27 = vpop.f32.mrb[1].mxu0 }
 0x10e   :  { %vm485_vm4 = vcmp.ge.f32.partialorder %v1057_v26, 0.0  ;;  %v486_v29 = vmul.f32 0.2, %v1057_v26 }
 0x110   :  { %v487_v30 = vsel %vm485_vm4, %v1057_v26, %v486_v29 }
 0x111   :  { %v504_v32 = vand.u32 4294901760, %v487_v30 }
 0x113   :  { %v581_v33 = vsub.f32 %v487_v30, %v504_v32  ;;  %1028 = vmatpush3.msra.mxu1 %v504_v32 }
 0x114   :  { %1030 = vmatmul.mubr.f32.vlgmr.msra.gmra.mrb[0].mxu1 %v573_v31  ;;  %1032 = vmatprep.subr.mxu1 %v1112_v3 }
 0x115   :  { %v582_v34 = vand.u32 4294901760, %v581_v33  ;;  %1034 = vmatprep.mubr.msk.f32.mxu1 %vm1113_vm1, %v1112_v3 }
 0x117   :  { %v583_v35 = vsub.f32 %v581_v33, %v582_v34 }
 0x119   :  { %v584_v36 = vand.u32 4294901760, %v583_v35 }
 0x11b   :  { %1033 = vmatpush3.msra.mxu1 %v584_v36 }
 0x11c   :  { %1035 = vmatmul.mubr.f32.vlgmr.msra.gmra.mrb[0].mxu1 %v569_v21  ;;  %1037 = vmatprep.subr.mxu1 %v1112_v3 }
 0x11d   :  { %1038 = vmatpush3.msra.mxu1 %v581_v33  ;;  %1039 = vmatprep.mubr.msk.f32.mxu1 %vm1113_vm1, %v1112_v3 }
 0x11e   :  { %1042 = vmatprep.subr.mxu1 %v1112_v3 }
 0x124   :  { %1040 = vmatmul.mubr.f32.vlgmr.msra.gmra.mrb[0].mxu1 %v570_v22 }
 0x125   :  { %1043 = vmatpush3.msra.mxu1 %v504_v32  ;;  %1044 = vmatprep.mubr.msk.f32.mxu1 %vm1113_vm1, %v1112_v3 }
 0x126   :  { %1047 = vmatprep.subr.mxu1 %v1112_v3 }
 0x12c   :  { %1045 = vmatmul.mubr.f32.vlgmr.msra.gmra.mrb[0].mxu1 %v571_v23 }
 0x12d   :  { %1048 = vmatpush3.msra.mxu1 %v582_v34  ;;  %1049 = vmatprep.mubr.msk.f32.mxu1 %vm1113_vm1, %v1112_v3 }
 0x12e   :  { %1052 = vmatprep.subr.mxu1 %v1112_v3 }
 0x134   :  { %1050 = vmatmul.mubr.f32.vlgmr.msra.gmra.mrb[0].mxu1 %v569_v21 }
 0x135   :  { %1053 = vmatpush3.msra.mxu1 %v504_v32  ;;  %1054 = vmatprep.mubr.msk.f32.mxu1 %vm1113_vm1, %v1112_v3 }
 0x13c   :  { %1055 = vmatmul.mubr.f32.vlgmr.msra.gmra.mrb[0].mxu1 %v569_v21 }
 0x20f   :  { %v945_v42 = vpop.f32.mrb[0].mxu1 }
 0x210   :  { %v1058_v43 = vadd.f32 %v945_v42, %v498_v41  ;;  %v1056_v44 = vpop.f32.mrb[1].mxu1 }
 0x212   :  { %v949_v45 = vand.u32 2147483647, %v1058_v43  ;;  %vm955_vm5 = vcmp.ge.f32.partialorder %v1058_v43, 0.0 }
 0x214   :  { %v950_v46 = vsub.f32 0.0, %v949_v45 }
 0x216   :  { %v951_v47 = vmul.f32 1.442695, %v950_v46 }
 0x218   :  { %1084 = vpow2.f32 %v951_v47 }
 0x222   :  { %v1085_v48 = vpop.eup %1084 }
 0x223   :  { %v953_v49 = vadd.f32 1.0, %v1085_v48 }
 0x225   :  { %1086 = vrcp.f32 %v953_v49 }
 0x22f   :  { %v1087_v50 = vpop.eup %1086 }
 0x230   :  { %v956_v51 = vmul.f32 %v1087_v50, %v1085_v48 }
 0x232   :  { %v957_v52 = vsel %vm955_vm5, %v1087_v50, %v956_v51 }
 0x233   :  { %958 = vst [vmem:[#allocation3] sm:$0x1] %v957_v52 }
 0x234   :  { %1099 = shalt.err (!%p1096_p4)
}
 0x235   :  { %s1100_s29 = scalar_lea.hbm %s1214_s5, 16 }
 0x236   :  { %p1101_p5 = scmp.ne.s32.totalorder %s1214_s5, %s1100_s29  ;;  %p1104_p6 = scmp.lt.u32.totalorder %s1100_s29, %s1214_s5 }
 0x238   :  { %p1106_p7 = pnand %p1104_p6, %p1101_p5 }
 0x23a   :  { %1109 = shalt.err (!%p1106_p7)
}
 0x23b   :  { %968 = dma.vmem_to_hbm [thread:$0]  %s966_s3, 16, %s1214_s5, [#allocation4]  }
 0x23c   :  { %1110 = dma.done.wait [#allocation4], 16  }
 0x23d   :  { %1111 = vsyncadd [#allocation4], 4294967280 }
 0x23e   :  { %972 = vsyncpa [#allocation4], 1 }

</bundles_post_ra>
